<compile_context>
chip_gen: v7x
topology: tpu7x:2x2x1
jax: 0.10.0
libtpu: 0.0.40
codegen_flags: <defaults>
</compile_context>

<pallas_src>
import functools

import jax
import jax.numpy as jnp
from jax.experimental import pallas as pl
from jax.experimental.pallas import tpu as pltpu

G_K = 3           # global g_k
G_LAMBDA = 0.1    # global g_lambda
POOLING = "mean"  # args.pooling choice exercised by the kernel

_LOSS_LANES = 128  # lane-dense per-row NLL output width


def _round_up(x, m):
    return (x + m - 1) // m * m


def _cdiv(a, b):
    return -(-a // b)


def _vmem_capacity_bytes():
    """Physical VMEM per TensorCore; conservative 64 MiB (v7x) if unknown."""
    try:
        info = pltpu.get_tpu_info()
        cap = getattr(info, "vmem_capacity_bytes", None)
        if cap:
            return int(cap)
    except Exception:
        pass
    return 64 << 20


def _choose_tiles(B, S, H, Lp, enc_itemsize=2):
    """Pick (batch tile, seq chunk, vmem limit).

    The enc tile is the dominant HBM traffic, so the seq chunk is sized to the
    largest double-buffered bf16 tile that fits the per-chip VMEM budget after
    accounting for resident weights / biases / targets / outputs / accumulator.
    """
    cap = _vmem_capacity_bytes()
    small_vmem = cap <= (64 << 20)  # v7x: 64 MiB per TC
    vmem_limit = min(cap * 3 // 4, (48 << 20) if small_vmem else (96 << 20))

    # Batch tile: full-height MXU M where possible, but keep >= 2 batch tiles
    # when B > 8 so the "parallel" axis can be sharded across v7x's two TCs.
    tb = min(128, _round_up(B, 8))
    if B > 8:
        tb = min(tb, _round_up(_cdiv(B, 2), 8))
    tb = max(8, tb)

    # Resident VMEM (assume x2 buffering for everything the pipeline manages).
    resident = 2 * (H * H + H * Lp) * 2              # w1, w2 (bf16)
    resident += 2 * (H + Lp) * 4                     # biases (f32)
    resident += 2 * tb * 4                           # targets (int32)
    resident += 2 * tb * (H + Lp + _LOSS_LANES) * 4  # output blocks (f32)
    resident += tb * H * 4                           # pooling accumulator (f32)

    enc_budget_cap = (16 << 20) if small_vmem else (40 << 20)
    enc_budget = max(2 << 20,
                     min(enc_budget_cap, vmem_limit - resident - (4 << 20)))

    # Double-buffered bf16 enc tile (tb, sc, H) must fit the budget.
    sc = enc_budget // (2 * tb * H * enc_itemsize)
    sc = max(16, (sc // 16) * 16)                    # bf16 packed sublane tile
    sc = min(sc, _round_up(S, 16))
    return tb, sc, int(vmem_limit)


def _head_kernel(enc_ref, w1_ref, b1_ref, w2_ref, b2_ref, tgt_ref,
                 pooled_ref, logits_ref, nll_ref, acc_ref,
                 *, labels_num, seq_len, batch_size, tb, sc):
    """Grid = (batch tiles [parallel], seq chunks [arbitrary, reduction])."""
    j = pl.program_id(1)

    @pl.when(j == 0)
    def _zero():
        acc_ref[...] = jnp.zeros_like(acc_ref)

    # pooling == 'mean': accumulate partial sequence sums in f32.
    x = enc_ref[...]                                            # [TB, SC, H] bf16
    if seq_len % sc != 0:
        # Ragged last sequence chunk: zero the out-of-range rows (OOB block
        # contents are undefined) before accumulating.
        s_idx = j * sc + jax.lax.broadcasted_iota(jnp.int32, (sc, 1), 0)
        x = jnp.where(s_idx < seq_len, x, jnp.zeros_like(x))
    acc_ref[...] += jnp.sum(x.astype(jnp.float32), axis=1)

    @pl.when(j == pl.num_programs(1) - 1)
    def _finish():
        pooled = acc_ref[...] * (1.0 / float(seq_len))          # [TB, H] f32
        pooled_ref[...] = pooled

        # output = tanh(output_layer_1(output))  — bf16 x bf16 -> f32 on MXU
        h = jnp.tanh(
            jnp.dot(pooled.astype(jnp.bfloat16), w1_ref[...],
                    preferred_element_type=jnp.float32)
            + b1_ref[...])                                      # [TB, H] f32

        # logits = output_layer_2(output)
        logits = (jnp.dot(h.astype(jnp.bfloat16), w2_ref[...],
                          preferred_element_type=jnp.float32)
                  + b2_ref[...])                                # [TB, Lp] f32

        tb_, lp_ = logits.shape
        col = jax.lax.broadcasted_iota(jnp.int32, (tb_, lp_), 1)
        logits = jnp.where(col < labels_num, logits, -1e30)     # mask pad cols
        logits_ref[...] = logits

        # NLLLoss(LogSoftmax(logits), tgt): per-row -log p(target).
        m = jnp.max(logits, axis=-1, keepdims=True)
        z = logits - m
        lse = jnp.log(jnp.sum(jnp.exp(z), axis=-1, keepdims=True))
        logp = z - lse                                          # [TB, Lp]

        tgt_mask = (col == tgt_ref[...])                        # iota == tgt
        row_nll = -jnp.sum(jnp.where(tgt_mask, logp, 0.0),
                           axis=-1, keepdims=True)              # [TB, 1]
        if batch_size % tb != 0:
            # Ragged last batch tile: zero the out-of-range rows.
            r_idx = (pl.program_id(0) * tb
                     + jax.lax.broadcasted_iota(jnp.int32, (tb_, 1), 0))
            row_nll = jnp.where(r_idx < batch_size, row_nll, 0.0)
        nll_ref[...] = jnp.broadcast_to(row_nll, nll_ref.shape)  # lane-dense


def classifier_head(enc, w1, b1, w2, b2, tgt, *, tb=None, sc=None,
                    interpret=False):
    """enc: [B,S,H] (bf16 preferred); w1:[H,H]; b1:[1,H]; w2:[H,L]; b2:[1,L];
    tgt:[B] int32.  Returns (pooled[B,H] f32, logits[B,L] f32, nll scalar)."""
    B, S, H = enc.shape
    L = w2.shape[1]
    Lp = _round_up(max(L, 1), 128)

    tb_auto, sc_auto, vmem_limit = _choose_tiles(B, S, H, Lp)
    tb = tb_auto if tb is None else max(8, _round_up(tb, 8))
    sc = sc_auto if sc is None else max(16, _round_up(sc, 16))
    sc = min(sc, _round_up(S, 16))

    n_b, n_s = _cdiv(B, tb), _cdiv(S, sc)

    # --- host-side dtype prep only (no padded copy of enc) ---
    enc_b = enc if enc.dtype == jnp.bfloat16 else enc.astype(jnp.bfloat16)
    w1_b = w1.astype(jnp.bfloat16)
    w2_b = jnp.zeros((H, Lp), jnp.bfloat16).at[:, :L].set(
        w2.astype(jnp.bfloat16))
    b1_f = b1.astype(jnp.float32).reshape(1, H)
    b2_f = jnp.zeros((1, Lp), jnp.float32).at[:, :L].set(
        b2.astype(jnp.float32).reshape(1, L))
    tgt_2d = tgt.astype(jnp.int32).reshape(B, 1)

    kernel = functools.partial(_head_kernel, labels_num=L, seq_len=S,
                               batch_size=B, tb=tb, sc=sc)

    flops = 2 * B * S * H + 2 * B * H * H + 2 * B * H * Lp
    bytes_accessed = (B * S * H * enc_b.dtype.itemsize
                      + (H * H + H * Lp) * 2 + (H + Lp) * 4 + B * 4
                      + B * (H + Lp + _LOSS_LANES) * 4)
    cost = pl.CostEstimate(flops=int(flops),
                           transcendentals=int(B * (H + Lp)),
                           bytes_accessed=int(bytes_accessed))

    pooled, logits, nll_rows = pl.pallas_call(
        kernel,
        out_shape=(
            jax.ShapeDtypeStruct((B, H), jnp.float32),
            jax.ShapeDtypeStruct((B, Lp), jnp.float32),
            jax.ShapeDtypeStruct((B, _LOSS_LANES), jnp.float32),
        ),
        grid=(n_b, n_s),
        in_specs=[
            pl.BlockSpec((tb, sc, H), lambda i, j: (i, j, 0)),   # enc tile
            pl.BlockSpec((H, H), lambda i, j: (0, 0)),           # w1 (resident)
            pl.BlockSpec((1, H), lambda i, j: (0, 0)),           # b1
            pl.BlockSpec((H, Lp), lambda i, j: (0, 0)),          # w2 (resident)
            pl.BlockSpec((1, Lp), lambda i, j: (0, 0)),          # b2
            pl.BlockSpec((tb, 1), lambda i, j: (i, 0)),          # int32 targets
        ],
        out_specs=(
            pl.BlockSpec((tb, H), lambda i, j: (i, 0)),          # pooled
            pl.BlockSpec((tb, Lp), lambda i, j: (i, 0)),         # logits
            pl.BlockSpec((tb, _LOSS_LANES), lambda i, j: (i, 0)),  # per-row NLL
        ),
        scratch_shapes=[pltpu.VMEM((tb, H), jnp.float32)],       # pool accum
        compiler_params=pltpu.CompilerParams(
            dimension_semantics=("parallel", "arbitrary"),
            vmem_limit_bytes=vmem_limit),
        cost_estimate=cost,
        interpret=interpret,
    )(enc_b, w1_b, b1_f, w2_b, b2_f, tgt_2d)

    # mean-reduction NLL over the global batch (padded/OOB rows contribute 0).
    nll = jnp.sum(nll_rows[:, 0]) / jnp.float32(B)
    return pooled, logits[:, :L], nll


def classifier_forward(params, src, tgt, seg):
    # Embedding: deterministic word-embedding lookup (glue, plain JAX).
    emb = params["word_emb"][src]                         # [B, S, H] bf16
    # TODO(synk): str2encoder[args.encoder] (full transformer encoder) is an
    # external UER-py dependency not defined in this module; embedding output
    # is fed straight to the classifier head.
    del seg
    enc = emb

    pooled, logits, nll = classifier_head(
        enc, params["w1"], params["b1"], params["w2"], params["b2"],
        tgt.astype(jnp.int32))

    # u, s, v = torch.svd(output); reg over the k smallest singular values.
    # (no Pallas SVD primitive; done in plain JAX on the kernel's pooled out)
    s = jnp.linalg.svd(pooled, compute_uv=False)          # descending order
    l1 = s.shape[0]
    reg = jnp.sum(s[l1 - G_K:] ** 2)                      # s[l1-1-i]^2, i<k
    loss_pt2 = reg * (G_LAMBDA / 39.0)

    # TODO(synk): soft_targets / MSE branch of the loss is not implemented
    # (default args.soft_targets == False path only).
    loss = nll + loss_pt2
    return loss, logits


def _reference_forward(params, src, tgt):
    """Pure-JAX reference with the same bf16 cast points as the kernel."""
    B = src.shape[0]
    emb = params["word_emb"][src]
    pooled = jnp.mean(emb.astype(jnp.float32), axis=1)
    h = jnp.tanh(jnp.dot(pooled.astype(jnp.bfloat16), params["w1"],
                         preferred_element_type=jnp.float32)
                 + params["b1"].astype(jnp.float32))
    logits = (jnp.dot(h.astype(jnp.bfloat16), params["w2"],
                      preferred_element_type=jnp.float32)
              + params["b2"].astype(jnp.float32))
    logp = jax.nn.log_softmax(logits, axis=-1)
    nll = -jnp.mean(logp[jnp.arange(B), tgt])
    s = jnp.linalg.svd(pooled, compute_uv=False)
    loss = nll + jnp.sum(s[s.shape[0] - G_K:] ** 2) * (G_LAMBDA / 39.0)
    return loss, logits


if __name__ == "__main__":
    # Small, lane/sublane-friendly shapes: H is a 128 multiple; B=16 gives two
    # batch tiles (exercises the parallel axis / v7x megacore split).
    B, S, H, L, VOCAB = 16, 32, 128, 5, 64

    key = jax.random.PRNGKey(0)
    k_emb, k_w1, k_w2, k_src, k_tgt = jax.random.split(key, 5)

    params = {
        "word_emb": jax.random.normal(k_emb, (VOCAB, H), jnp.float32
                                      ).astype(jnp.bfloat16),
        "w1": (0.1 * jax.random.normal(k_w1, (H, H), jnp.float32)
               ).astype(jnp.bfloat16),
        "b1": jnp.zeros((1, H), jnp.float32),
        "w2": (0.2 * jax.random.normal(k_w2, (H, L), jnp.float32)
               ).astype(jnp.bfloat16),
        "b2": jnp.zeros((1, L), jnp.float32),
    }

    src = jax.random.randint(k_src, (B, S), 0, VOCAB, dtype=jnp.int32)
    seg = jnp.ones((B, S), jnp.int32)
    tgt = jax.random.randint(k_tgt, (B,), 0, L, dtype=jnp.int32)

    loss, logits = classifier_forward(params, src, tgt, seg)
    jax.block_until_ready((loss, logits))
    assert logits.shape == (B, L)
    assert bool(jnp.isfinite(loss))

    # Correctness vs. a pure-JAX reference (same bf16 cast points).
    loss_ref, logits_ref = _reference_forward(params, src, tgt)
    assert jnp.allclose(logits, logits_ref, atol=2e-2, rtol=2e-2)
    assert jnp.allclose(loss, loss_ref, atol=2e-2, rtol=2e-2)

    # Also exercise the multi-chunk sequence reduction (sc override -> 2
    # chunks, accumulator init/finish across grid steps) and compare.
    enc = params["word_emb"][src]
    pooled2, logits2, nll2 = classifier_head(
        enc, params["w1"], params["b1"], params["w2"], params["b2"],
        tgt, sc=16)
    jax.block_until_ready((pooled2, logits2, nll2))
    assert jnp.allclose(logits2, logits_ref, atol=2e-2, rtol=2e-2)

    print("KERNEL_OK")
</pallas_src>

<mosaic_0001>
module attributes {stable_mosaic.version = 11 : i64} {
  func.func @_head_kernel(%arg0: i32, %arg1: i32, %arg2: memref<8x32x128xbf16, #tpu.memory_space<vmem>>, %arg3: memref<128x128xbf16, #tpu.memory_space<vmem>>, %arg4: memref<1x128xf32, #tpu.memory_space<vmem>>, %arg5: memref<128x128xbf16, #tpu.memory_space<vmem>>, %arg6: memref<1x128xf32, #tpu.memory_space<vmem>>, %arg7: memref<8x1xi32, #tpu.memory_space<vmem>>, %arg8: memref<8x128xf32, #tpu.memory_space<vmem>>, %arg9: memref<8x128xf32, #tpu.memory_space<vmem>>, %arg10: memref<8x128xf32, #tpu.memory_space<vmem>>, %arg11: memref<8x128xf32, #tpu.memory_space<vmem>>) attributes {dimension_semantics = [#tpu.dimension_semantics<parallel>, #tpu.dimension_semantics<arbitrary>], iteration_bounds = array<i64: 2, 1>, scalar_prefetch = 0 : i64, scratch_operands = 1 : i64, tpu.core_type = #tpu.core_type<tc>, window_params = [{transform_indices = @transform_0, window_bounds = array<i64: 8, 32, 128>}, {pipeline_mode = #tpu.pipeline_mode<synchronous>, transform_indices = @transform_1, window_bounds = array<i64: 128, 128>}, {pipeline_mode = #tpu.pipeline_mode<synchronous>, transform_indices = @transform_2, window_bounds = array<i64: 1, 128>}, {pipeline_mode = #tpu.pipeline_mode<synchronous>, transform_indices = @transform_3, window_bounds = array<i64: 128, 128>}, {pipeline_mode = #tpu.pipeline_mode<synchronous>, transform_indices = @transform_4, window_bounds = array<i64: 1, 128>}, {transform_indices = @transform_5, window_bounds = array<i64: 8, 1>}, {transform_indices = @transform_6, window_bounds = array<i64: 8, 128>}, {transform_indices = @transform_7, window_bounds = array<i64: 8, 128>}, {transform_indices = @transform_8, window_bounds = array<i64: 8, 128>}]} {
    %c0_i32 = arith.constant 0 : i32
    %0 = arith.cmpi eq, %arg1, %c0_i32 : i32
    %1 = arith.extui %0 : i1 to i32
    %c0_i32_0 = arith.constant 0 : i32
    %2 = arith.cmpi ne, %1, %c0_i32_0 : i32
    scf.if %2 {
      %cst_9 = arith.constant 0.000000e+00 : f32
      %12 = vector.broadcast %cst_9 : f32 to vector<8x128xf32>
      %c0_10 = arith.constant 0 : index
      %c0_11 = arith.constant 0 : index
      %13 = vector.load %arg11[%c0_10, %c0_11] : memref<8x128xf32, #tpu.memory_space<vmem>>, vector<8x128xf32>
      tpu.vector_store %arg11[%c0_10, %c0_11], %12 {strides = array<i32>} : memref<8x128xf32, #tpu.memory_space<vmem>>, vector<8x128xf32>,
    } else {
    }
    %c0 = arith.constant 0 : index
    %c0_1 = arith.constant 0 : index
    %c0_2 = arith.constant 0 : index
    %3 = vector.load %arg2[%c0, %c0_1, %c0_2] : memref<8x32x128xbf16, #tpu.memory_space<vmem>>, vector<8x32x128xbf16>
    %c0_3 = arith.constant 0 : index
    %c0_4 = arith.constant 0 : index
    %4 = vector.load %arg11[%c0_3, %c0_4] : memref<8x128xf32, #tpu.memory_space<vmem>>, vector<8x128xf32>
    %5 = arith.extf %3 : vector<8x32x128xbf16> to vector<8x32x128xf32>
    %cst = arith.constant dense<0.000000e+00> : vector<8x128xf32>
    %6 = vector.multi_reduction <add>, %5, %cst [1] : vector<8x32x128xf32> to vector<8x128xf32>
    %7 = arith.addf %4, %6 : vector<8x128xf32>
    %c0_5 = arith.constant 0 : index
    %c0_6 = arith.constant 0 : index
    %8 = vector.load %arg11[%c0_5, %c0_6] : memref<8x128xf32, #tpu.memory_space<vmem>>, vector<8x128xf32>
    tpu.vector_store %arg11[%c0_5, %c0_6], %7 {strides = array<i32>} : memref<8x128xf32, #tpu.memory_space<vmem>>, vector<8x128xf32>,
    %c0_i32_7 = arith.constant 0 : i32
    %9 = arith.cmpi eq, %arg1, %c0_i32_7 : i32
    %10 = arith.extui %9 : i1 to i32
    %c0_i32_8 = arith.constant 0 : i32
    %11 = arith.cmpi ne, %10, %c0_i32_8 : i32
    scf.if %11 {
      %c0_9 = arith.constant 0 : index
      %c0_10 = arith.constant 0 : index
      %12 = vector.load %arg11[%c0_9, %c0_10] : memref<8x128xf32, #tpu.memory_space<vmem>>, vector<8x128xf32>
      %cst_11 = arith.constant 3.125000e-02 : f32
      %13 = vector.broadcast %cst_11 : f32 to vector<8x128xf32>
      %14 = arith.mulf %12, %13 : vector<8x128xf32>
      %c0_12 = arith.constant 0 : index
      %c0_13 = arith.constant 0 : index
      %15 = vector.load %arg8[%c0_12, %c0_13] : memref<8x128xf32, #tpu.memory_space<vmem>>, vector<8x128xf32>
      tpu.vector_store %arg8[%c0_12, %c0_13], %14 {strides = array<i32>} : memref<8x128xf32, #tpu.memory_space<vmem>>, vector<8x128xf32>,
      %16 = arith.truncf %14 : vector<8x128xf32> to vector<8x128xbf16>
      %c0_14 = arith.constant 0 : index
      %c0_15 = arith.constant 0 : index
      %17 = vector.load %arg3[%c0_14, %c0_15] : memref<128x128xbf16, #tpu.memory_space<vmem>>, vector<128x128xbf16>
      %cst_16 = arith.constant dense<0.000000e+00> : vector<8x128xf32>
      %18 = tpu.matmul %16, %17, %cst_16 {dimension_numbers = #tpu.dot_dimension_numbers<[1], [0], [0], [1], [0, 0, 1, 1], [], []>} : vector<8x128xbf16>, vector<128x128xbf16>, vector<8x128xf32> -> vector<8x128xf32>
      %c0_17 = arith.constant 0 : index
      %c0_18 = arith.constant 0 : index
      %19 = vector.load %arg4[%c0_17, %c0_18] : memref<1x128xf32, #tpu.memory_space<vmem>>, vector<1x128xf32>
      %20 = vector.broadcast %19 : vector<1x128xf32> to vector<8x128xf32>
      %21 = arith.addf %18, %20 : vector<8x128xf32>
      %22 = math.tanh %21 : vector<8x128xf32>
      %23 = arith.truncf %22 : vector<8x128xf32> to vector<8x128xbf16>
      %c0_19 = arith.constant 0 : index
      %c0_20 = arith.constant 0 : index
      %24 = vector.load %arg5[%c0_19, %c0_20] : memref<128x128xbf16, #tpu.memory_space<vmem>>, vector<128x128xbf16>
      %cst_21 = arith.constant dense<0.000000e+00> : vector<8x128xf32>
      %25 = tpu.matmul %23, %24, %cst_21 {dimension_numbers = #tpu.dot_dimension_numbers<[1], [0], [0], [1], [0, 0, 1, 1], [], []>} : vector<8x128xbf16>, vector<128x128xbf16>, vector<8x128xf32> -> vector<8x128xf32>
      %c0_22 = arith.constant 0 : index
      %c0_23 = arith.constant 0 : index
      %26 = vector.load %arg6[%c0_22, %c0_23] : memref<1x128xf32, #tpu.memory_space<vmem>>, vector<1x128xf32>
      %27 = vector.broadcast %26 : vector<1x128xf32> to vector<8x128xf32>
      %28 = arith.addf %25, %27 : vector<8x128xf32>
      %29 = tpu.iota {dimensions = array<i32: 1>} : vector<8x128xi32>
      %c5_i32 = arith.constant 5 : i32
      %30 = vector.broadcast %c5_i32 : i32 to vector<8x128xi32>
      %31 = arith.cmpi slt, %29, %30 : vector<8x128xi32>
      %cst_24 = arith.constant -1.000000e+30 : f32
      %32 = vector.broadcast %cst_24 : f32 to vector<8x128xf32>
      %33 = arith.select %31, %28, %32 : vector<8x128xi1>, vector<8x128xf32>
      %c0_25 = arith.constant 0 : index
      %c0_26 = arith.constant 0 : index
      %34 = vector.load %arg9[%c0_25, %c0_26] : memref<8x128xf32, #tpu.memory_space<vmem>>, vector<8x128xf32>
      tpu.vector_store %arg9[%c0_25, %c0_26], %33 {strides = array<i32>} : memref<8x128xf32, #tpu.memory_space<vmem>>, vector<8x128xf32>,
      %cst_27 = arith.constant dense<0xFF800000> : vector<8xf32>
      %35 = vector.multi_reduction <maximumf>, %33, %cst_27 [1] : vector<8x128xf32> to vector<8xf32>
      %36 = vector.shape_cast %35 : vector<8xf32> to vector<8x1xf32>
      %37 = vector.broadcast %36 : vector<8x1xf32> to vector<8x128xf32>
      %38 = arith.subf %33, %37 : vector<8x128xf32>
      %39 = math.exp %38 : vector<8x128xf32>
      %cst_28 = arith.constant dense<0.000000e+00> : vector<8xf32>
      %40 = vector.multi_reduction <add>, %39, %cst_28 [1] : vector<8x128xf32> to vector<8xf32>
      %41 = vector.shape_cast %40 : vector<8xf32> to vector<8x1xf32>
      %42 = math.log %41 : vector<8x1xf32>
      %43 = vector.broadcast %42 : vector<8x1xf32> to vector<8x128xf32>
      %44 = arith.subf %38, %43 : vector<8x128xf32>
      %c0_29 = arith.constant 0 : index
      %c0_30 = arith.constant 0 : index
      %45 = vector.load %arg7[%c0_29, %c0_30] : memref<8x1xi32, #tpu.memory_space<vmem>>, vector<8x1xi32>
      %46 = vector.broadcast %45 : vector<8x1xi32> to vector<8x128xi32>
      %47 = arith.cmpi eq, %29, %46 : vector<8x128xi32>
      %cst_31 = arith.constant 0.000000e+00 : f32
      %48 = vector.broadcast %cst_31 : f32 to vector<8x128xf32>
      %49 = arith.select %47, %44, %48 : vector<8x128xi1>, vector<8x128xf32>
      %cst_32 = arith.constant dense<0.000000e+00> : vector<8xf32>
      %50 = vector.multi_reduction <add>, %49, %cst_32 [1] : vector<8x128xf32> to vector<8xf32>
      %51 = vector.shape_cast %50 : vector<8xf32> to vector<8x1xf32>
      %cst_33 = arith.constant 0.000000e+00 : f32
      %52 = vector.broadcast %cst_33 : f32 to vector<8x1xf32>
      %53 = arith.subf %52, %51 : vector<8x1xf32>
      %54 = vector.shape_cast %53 : vector<8x1xf32> to vector<8x1xf32>
      %55 = vector.broadcast %54 : vector<8x1xf32> to vector<8x128xf32>
      %c0_34 = arith.constant 0 : index
      %c0_35 = arith.constant 0 : index
      %56 = vector.load %arg10[%c0_34, %c0_35] : memref<8x128xf32, #tpu.memory_space<vmem>>, vector<8x128xf32>
      tpu.vector_store %arg10[%c0_34, %c0_35], %55 {strides = array<i32>} : memref<8x128xf32, #tpu.memory_space<vmem>>, vector<8x128xf32>,
    } else {
    }
    return
  }
  func.func @transform_0(%arg0: i32, %arg1: i32) -> (i32, i32, i32) {
    %c0_i32 = arith.constant 0 : i32
    %c0_i32_0 = arith.constant 0 : i32
    return %arg0, %arg1, %c0_i32 : i32, i32, i32
  }
  func.func @transform_1(%arg0: i32, %arg1: i32) -> (i32, i32) {
    %c0_i32 = arith.constant 0 : i32
    %c0_i32_0 = arith.constant 0 : i32
    %c0_i32_1 = arith.constant 0 : i32
    return %c0_i32, %c0_i32_0 : i32, i32
  }
  func.func @transform_2(%arg0: i32, %arg1: i32) -> (i32, i32) {
    %c0_i32 = arith.constant 0 : i32
    %c0_i32_0 = arith.constant 0 : i32
    %c0_i32_1 = arith.constant 0 : i32
    return %c0_i32, %c0_i32_0 : i32, i32
  }
  func.func @transform_3(%arg0: i32, %arg1: i32) -> (i32, i32) {
    %c0_i32 = arith.constant 0 : i32
    %c0_i32_0 = arith.constant 0 : i32
    %c0_i32_1 = arith.constant 0 : i32
    return %c0_i32, %c0_i32_0 : i32, i32
  }
  func.func @transform_4(%arg0: i32, %arg1: i32) -> (i32, i32) {
    %c0_i32 = arith.constant 0 : i32
    %c0_i32_0 = arith.constant 0 : i32
    %c0_i32_1 = arith.constant 0 : i32
    return %c0_i32, %c0_i32_0 : i32, i32
  }
  func.func @transform_5(%arg0: i32, %arg1: i32) -> (i32, i32) {
    %c0_i32 = arith.constant 0 : i32
    %c0_i32_0 = arith.constant 0 : i32
    return %arg0, %c0_i32 : i32, i32
  }
  func.func @transform_6(%arg0: i32, %arg1: i32) -> (i32, i32) {
    %c0_i32 = arith.constant 0 : i32
    %c0_i32_0 = arith.constant 0 : i32
    return %arg0, %c0_i32 : i32, i32
  }
  func.func @transform_7(%arg0: i32, %arg1: i32) -> (i32, i32) {
    %c0_i32 = arith.constant 0 : i32
    %c0_i32_0 = arith.constant 0 : i32
    return %arg0, %c0_i32 : i32, i32
  }
  func.func @transform_8(%arg0: i32, %arg1: i32) -> (i32, i32) {
    %c0_i32 = arith.constant 0 : i32
    %c0_i32_0 = arith.constant 0 : i32
    return %arg0, %c0_i32 : i32, i32
  }
}

</mosaic_0001>

<bundles_post_ra>
// kernel: tpu_custom_call.1
= control target key start
LH: loop header
LB: loop body
LE: loop exit
PB: predicated region body
PF: predicated region fallthrough
CT: control target
= control target key end

     0   :  { %s2058_s0 = inlined_call_operand.hbm [shape: bf16[16,32,128], index: 0, kind: input, shape index: {}]   ;;  %s2059_s1 = inlined_call_operand.hbm [shape: bf16[128,128], index: 1, kind: input, shape index: {}]   ;;  %s2060_s2 = inlined_call_operand.vmem [shape: f32[1,128], index: 2, kind: input, shape index: {}]   ;;  %s2061_s3 = inlined_call_operand.hbm [shape: bf16[128,128], index: 3, kind: input, shape index: {}]   ;;  %s2062_s4 = inlined_call_operand.vmem [shape: f32[1,128], index: 4, kind: input, shape index: {}]   ;;  %s2063_s5 = inlined_call_operand.vmem [shape: s32[16,1], index: 5, kind: input, shape index: {}]   ;;  %s2064_s6 = inlined_call_operand.hbm [shape: f32[16,128], index: 6, kind: output, shape index: {0}]   ;;  %s2065_s7 = inlined_call_operand.hbm [shape: f32[16,128], index: 7, kind: output, shape index: {1}]   ;;  %s2066_s8 = inlined_call_operand.hbm [shape: f32[16,128], index: 8, kind: output, shape index: {2}]  }
   0x1   :  { %2075 = sst [smem:[#allocation19_spill]] %s2058_s0 }
   0x2   :  { %14 = vsyncpa [#allocation4], 0 }
   0x3   :  { %16 = vsyncpa [#allocation4 + $0x1], 0 }
   0x4   :  { %17 = vsyncpa [#allocation7], 0 }
   0x5   :  { %18 = vsyncpa [#allocation5], 0 }
   0x6   :  { %20 = vsyncpa [#allocation5 + $0x1], 0 }
   0x7   :  { %21 = vsyncpa [#allocation11], 0 }
   0x8   :  { %23 = vsyncpa [#allocation11 + $0x1], 0  ;;  %s1649_s27 = smov 0   ;;  %s1651_s28 = smov 0  }
   0x9   :  { %s1653_s29 = smov 0   ;;  %s1655_s30 = smov 0  }
   0xa   :  { %s1657_s9 = smov 0   ;;  %s1659_s10 = smov 0  }
   0xb LB: > { %2076 = sst [smem:[#allocation17_spill]] %s1571_s27  ;;  %s1680_s11 = sadd.s32 4294967295, %s1591_s10   ;;  %s1591_s10 = sphi %s1659_s10, %s29_s10   ;;  %s1587_s9 = sphi %s1657_s9, %s2101_s9   ;;  %s1583_s30 = sphi %s1655_s30, %s2100_s30   ;;  %s1579_s29 = sphi %s1653_s29, %s2099_s29   ;;  %s1575_s28 = sphi %s1651_s28, %s2098_s28   ;;  %s1571_s27 = sphi %s1649_s27, %s2097_s27  }
   0xc   : > { %s2068_s12 = sadd.s32 4294967294, %s1591_s10   ;;  %p63_p0 = scmp.ne.s32.totalorder %s1575_s28, %s1571_s27 }
   0xd   : > { %p2067_p1 = scmp.eq.s32.totalorder %s1680_s11, 0  ;;  %p203_p3 = scmp.eq.s32.totalorder %s2068_s12, 1 }
   0xe   : > { %p1056_p5 = scmp.ge.s32.totalorder %s1591_s10, 1  ;;  %p262_p7 = scmp.lt.s32.totalorder %s1591_s10, 3 }
   0xf   : > { %p1691_p4 = por %p2067_p1, %p63_p0  ;;  %p1696_p6 = por %p203_p3, %p63_p0 }
  0x10   : > { %p1701_p8 = pnand %p1056_p5, %p262_p7  ;;  %s1593_s16 = smov [#allocation6]  }
  0x11   : > { %s2077_s13 = scalar_select %p1691_p4, 1, 0 }
  0x12   : > { %s2078_s14 = scalar_select %p1696_p6, 1, 0 }
  0x13   : > { %s274_s17 = sshll.u32 %s1593_s16, 4  ;;  %p1253_p9 = pneg %p1701_p8  ;;  %s1705_s17 = int_to_ptr.vmem [resolvable:$true] %s274_s17 }
  0x14   : > { %2079 = sst [smem:[#allocation18_spill]] %s2078_s14  ;;  %s1594_s19 = smov [#allocation8]  }
  0x15   : > { %p1712_p11 = pnand %p1253_p9, %p2067_p1  ;;  %s290_s20 = sshll.u32 %s1594_s19, 4  ;;  %s1716_s20 = int_to_ptr.vmem [resolvable:$true] %s290_s20 }
  0x16   : > { %s1359_s23 = scalar_lea.hbm %s2059_s1, 1024 }
  0x17   : > { %p1360_p12 = scmp.ne.s32.totalorder %s2059_s1, %s1359_s23  ;;  %p1361_p13 = pneg %p1712_p11 }
  0x18   : > { %p1366_p5 = scmp.lt.u32.totalorder %s1359_s23, %s2059_s1 }
  0x19   : > { %p1362_p0 = pnand %p1361_p13, %p1360_p12 }
  0x1b   : > { %p1363_p3 = pneg %p1362_p0 }
  0x1d   : > { %p1368_p7 = pnand %p1366_p5, %p1363_p3 }
  0x1f   : > { %1371 = shalt.err (!%p1368_p7)
}
  0x20   : > { %s1372_s19 = scalar_lea.vmem %s1705_s17, 1024  ;;  %p1380_p2 = scmp.lt.s32.totalorder %s1705_s17, %s1705_s17 }
  0x21   : > { %p1373_p9 = scmp.ne.s32.totalorder %s1705_s17, %s1372_s19  ;;  %p1381_p12 = scmp.lt.s32.totalorder %s1372_s19, %s1372_s19 }
  0x23   : > { %p1375_p10 = pnand %p1373_p9, %p1361_p13  ;;  %p1382_p0 = por %p1381_p12, %p1380_p2 }
  0x25   : > { %p1376_p1 = pneg %p1375_p10 }
  0x27   : > { %p1383_p6 = pnand %p1382_p0, %p1376_p1 }
  0x29   : > { %1386 = shalt.err (!%p1383_p6)
}
  0x2a   : > { %s2071_s21 = smov 64   ;;  %s2072_s22 = smov 4  }
  0x2b   : > { %1256 = dma.hbm_to_vmem [thread:$0]  (!%p1712_p11), %s2059_s1, 1024, %s1705_s17, [#allocation7], %s2071_s21, %s2071_s21, %s2072_s22  }
  0x2c   : > { %s1387_s16 = scalar_lea.hbm %s2061_s3, 1024 }
  0x2d   : > { %p1388_p1 = scmp.ne.s32.totalorder %s2061_s3, %s1387_s16  ;;  %p1394_p10 = scmp.lt.u32.totalorder %s1387_s16, %s2061_s3 }
  0x2f   : > { %p1390_p2 = pnand %p1388_p1, %p1361_p13 }
  0x31   : > { %p1391_p6 = pneg %p1390_p2 }
  0x33   : > { %p1396_p3 = pnand %p1394_p10, %p1391_p6 }
  0x35   : > { %1399 = shalt.err (!%p1396_p3)
}
  0x36   : > { %s1400_s17 = scalar_lea.vmem %s1716_s20, 1024  ;;  %p1408_p12 = scmp.lt.s32.totalorder %s1716_s20, %s1716_s20 }
  0x37   : > { %p1401_p5 = scmp.ne.s32.totalorder %s1716_s20, %s1400_s17  ;;  %p1409_p0 = scmp.lt.s32.totalorder %s1400_s17, %s1400_s17 }
  0x39   : > { %p1403_p7 = pnand %p1401_p5, %p1361_p13  ;;  %p1410_p1 = por %p1409_p0, %p1408_p12 }
  0x3b   : > { %p1404_p9 = pneg %p1403_p7 }
  0x3d   : > { %p1411_p2 = pnand %p1410_p1, %p1404_p9 }
  0x3f   : > { %1414 = shalt.err (!%p1411_p2)
}
  0x40   : > { %1259 = dma.hbm_to_vmem [thread:$0]  (!%p1712_p11), %s2061_s3, 1024, %s1716_s20, [#allocation7], %s2071_s21, %s2071_s21, %s2072_s22  }
  0x41   : > { %s41_s14 = sadd.s32 1, %s1587_s9  ;;  %s50_s18 = sadd.s32 1, %s1579_s29 }
  0x42   : > { %p43_p13 = scmp.ge.s32.totalorder %s41_s14, 2  ;;  %p57_p6 = scmp.ne.s32.totalorder %s1579_s29, %s1575_s28 }
  0x43   : > { %p58_p10 = scmp.eq.s32.totalorder %s1591_s10, 0  ;;  %p1276_p3 = scmp.lt.s32.totalorder %s1591_s10, 2 }
  0x44   : > { %s2103_s14 = smov (%p43_p13, %s41_s14), 0  ;;  %p2082_p7 = scmp.eq.s32.totalorder %s1680_s11, 1 }
  0x45   : > { %p59_p5 = por %p58_p10, %p57_p6  ;;  %s45_s24 = ssub.s32 %s1587_s9, %s2103_s14 }
  0x46   : > { %p1786_p9 = por %p2082_p7, %p57_p6  ;;  %s307_s25 = sand.u32 1, %s1579_s29  }
  0x47   : > { %p48_p12 = scmp.eq.s32.totalorder %s45_s24, 0  ;;  %s1060_s20 = sshll.u32 %s307_s25, 7 }
  0x48   : > { %s2083_s23 = scalar_select %p1786_p9, 1, 0 }
  0x49   : > { %s1099_s26 = sshll.u32 %s1587_s9, 11  ;;  %s2084_s0 = sld [smem:[#allocation19_spill]] }
  0x4a   : > { %s1795_s16 = scalar_select %p48_p12, %s1579_s29, %s50_s18  }
  0x4b   : > { %s311_s12 = scalar_lea.vmem [#allocation3], %s1060_s20  ;;  %p1804_p11 = pnand %p1276_p3, %p59_p5 }
  0x4c   : > { %s321_s21 = sshll.u32 %s311_s12, 4  ;;  %s1810_s18 = scalar_lea.sflag [#allocation4], %s307_s25  ;;  %s1808_s21 = int_to_ptr.vmem [resolvable:$true] %s321_s21 }
  0x4d   : > { %p1417_p1 = pneg %p1804_p11 }
  0x4f   : > { %s1800_s27 = scalar_lea.hbm %s2084_s0, %s1099_s26  ;;  %s1420_s19 = scalar_lea.hbm %s2084_s0, 4096 }
  0x50   : > { %s1415_s24 = scalar_lea.hbm %s1800_s27, 2048  ;;  %p1421_p6 = scmp.lt.u32.totalorder %s1800_s27, %s2084_s0 }
  0x51   : > { %p1416_p0 = scmp.ne.s32.totalorder %s1800_s27, %s1415_s24  ;;  %p1422_p10 = scmp.lt.u32.totalorder %s1420_s19, %s1415_s24 }
  0x52   : > { %p1424_p5 = scmp.lt.u32.totalorder %s1415_s24, %s1800_s27 }
  0x53   : > { %p1418_p2 = pnand %p1417_p1, %p1416_p0  ;;  %p1423_p3 = por %p1422_p10, %p1421_p6 }
  0x55   : > { %p1419_p13 = pneg %p1418_p2  ;;  %p1425_p7 = por %p1424_p5, %p1423_p3 }
  0x57   : > { %p1426_p12 = pnand %p1425_p7, %p1419_p13 }
  0x59   : > { %1429 = shalt.err (!%p1426_p12)
}
  0x5a   : > { %s1430_s25 = scalar_lea.vmem %s1808_s21, 2048  ;;  %s1597_s20 = smov [#allocation3]  }
  0x5b   : > { %p1431_p0 = scmp.ne.s32.totalorder %s1808_s21, %s1430_s25  ;;  %s1435_s26 = sshll.u32 %s1597_s20, 4  ;;  %s1436_s26 = int_to_ptr.vmem [resolvable:$false] %s1435_s26 }
  0x5c   : > { %s1437_s17 = scalar_lea.vmem %s1436_s26, 4096  ;;  %p1438_p4 = scmp.lt.s32.totalorder %s1808_s21, %s1436_s26 }
  0x5d   : > { %p1433_p2 = pnand %p1431_p0, %p1417_p1  ;;  %p1439_p6 = scmp.lt.s32.totalorder %s1437_s17, %s1430_s25 }
  0x5f   : > { %p1434_p9 = pneg %p1433_p2  ;;  %p1440_p10 = por %p1439_p6, %p1438_p4 }
  0x61   : > { %p1441_p3 = pnand %p1440_p10, %p1434_p9 }
  0x63   : > { %1444 = shalt.err (!%p1441_p3)
}
  0x64   : > { %s2086_s24 = smov 4   ;;  %s2087_s19 = smov 64  }
  0x65   : > { %1263 = dma.hbm_to_vmem [thread:$0]  (!%p1804_p11), %s1800_s27, 2048, %s1808_s21, %s1810_s18, %s2087_s19, %s2087_s19, %s2086_s24  }
  0x66   : > { %340 = sbr.rel (%p1701_p8) target bundleno = 1069 (0x42d), region = 44  ;;  %s1844_s12 = sand.u32 (!%p1701_p8), 1, %s1575_s28  }
  0x67   : > { %s1065_s25 = sshll.u32 (!%p1701_p8), %s1844_s12, 7  ;;  %s343_s20 = scalar_lea.sflag (!%p1701_p8), [#allocation4], %s1844_s12 }
  0x68   : > { %s1848_s26 = scalar_lea.vmem (!%p1701_p8), [#allocation3], %s1065_s25  ;;  %p2088_p4 = scmp.ne.s32.totalorder (!%p1701_p8), %s2077_s13, 0 }
  0x6d   : > { %1554 = dma.done.wait (%p2088_p4), %s343_s20, 2048  }
  0x6e   : > { %1556 = vsyncadd (%p2088_p4), %s343_s20, 4294965248  ;;  %p2089_p9 = scmp.eq.s32.totalorder %s1680_s11, 0 }
  0x70   : > { %1558 = dma.done.wait (%p2089_p9), [#allocation7], 2048   ;;  %p2090_p8 = pmov %p2089_p9 }
  0x71   : > { %v1598_v0 = vmov 0.0   ;;  %vm1599_vm0 = vmmov 0   ;;  %v1337_v1 = vld [vmem:[#allocation6] sm:$0xff]   ;;  %v1338_v2 = vld [vmem:[#allocation6 + $0x8] sm:$0xff]   ;;  %v1339_v3 = vld [vmem:[#allocation6 + $0x10] sm:$0xff]   ;;  %vm558_vm1 = vcmask 1041409  }
  0x72   : > { %1560 = vsyncadd (%p2090_p8), [#allocation7], 4294965248  ;;  %1197 = vmatprep.subr.bf16.mxu0 %v1598_v0  ;;  %1213 = vmatprep.mubr.msk.bf16.mxu0 %vm1599_vm0, %v1598_v0  ;;  %v1340_v4 = vld [vmem:[#allocation6 + $0x18] sm:$0xff]   ;;  %v1101_v5 = vld [vmem:[%s1848_s26] sm:$0xff]   ;;  %vm560_vm2 = vcmask 1042434   ;;  %vm562_vm3 = vcmask 1043459  }
  0x73   : > { %1217 = vmatprep.subr.bf16.mxu1 %v1598_v0  ;;  %1233 = vmatprep.mubr.msk.bf16.mxu1 %vm1599_vm0, %v1598_v0  ;;  %v1866_v6 = vld [vmem:[%s1848_s26 + $0x8] sm:$0xff]   ;;  %v1165_v7 = vld [vmem:[%s1848_s26 + $0x10] sm:$0xff]   ;;  %v1102_v8 = vunpack.c.l.bf16 %v1101_v5  ;;  %v1103_v9 = vunpack.c.h.bf16 %v1101_v5  ;;  %v1872_v12 = vld [vmem:[%s1848_s26 + $0x18] sm:$0xff]   ;;  %vm564_vm4 = vcmask 1044484   ;;  %vm566_vm5 = vcmask 1045509   ;;  %s1931_s27 = sshll.u32 %s1844_s12, 3 }
  0x74   : > { %1198 = vmatpush3.bf16.msra.mxu0 %v1337_v1  ;;  %v1106_v10 = vunpack.c.l.bf16 %v1866_v6  ;;  %v1107_v11 = vunpack.c.h.bf16 %v1866_v6  ;;  %v1167_v13 = vld [vmem:[%s1848_s26 + $0x20] sm:$0xff]   ;;  %v1876_v14 = vld [vmem:[%s1848_s26 + $0x28] sm:$0xff]   ;;  %v1110_v15 = vunpack.c.l.bf16 %v1165_v7  ;;  %v1111_v16 = vunpack.c.h.bf16 %v1165_v7  ;;  %v1169_v19 = vld [vmem:[%s1848_s26 + $0x30] sm:$0xff]   ;;  %s393_s18 = scalar_lea.vmem [#allocation10], %s1931_s27  ;;  %p403_p11 = scmp.lt.s32.totalorder %s1583_s30, 1 }
  0x75   : > { %1199 = vmatprep.subr.bf16.mxu0 %v1598_v0  ;;  %v1114_v17 = vunpack.c.l.bf16 %v1872_v12  ;;  %v1115_v18 = vunpack.c.h.bf16 %v1872_v12  ;;  %v1882_v20 = vld [vmem:[%s1848_s26 + $0x38] sm:$0xff]   ;;  %v1171_v21 = vld [vmem:[%s1848_s26 + $0x40] sm:$0xff]   ;;  %v1118_v22 = vunpack.c.l.bf16 %v1167_v13  ;;  %v1119_v23 = vunpack.c.h.bf16 %v1167_v13  ;;  %v1889_v26 = vld [vmem:[%s1848_s26 + $0x48] sm:$0xff]   ;;  %s1943_s13 = sshll.u32 %s1583_s30, 7  ;;  %p2091_p13 = scmp.ne.s32.totalorder %s2083_s23, 0 }
  0x76   : > { %v1122_v24 = vunpack.c.l.bf16 %v1876_v14  ;;  %v1123_v25 = vunpack.c.h.bf16 %v1876_v14  ;;  %v1173_v27 = vld [vmem:[%s1848_s26 + $0x50] sm:$0xff]   ;;  %v1174_v28 = vld [vmem:[%s1848_s26 + $0x58] sm:$0xff]   ;;  %v1341_v29 = vld [vmem:[#allocation6 + $0x20] sm:$0xff]   ;;  %v1126_v30 = vunpack.c.l.bf16 %v1169_v19  ;;  %v1127_v31 = vunpack.c.h.bf16 %v1169_v19  ;;  %s404_s17 = scalar_select %p403_p11, %s1583_s30, 1 }
  0x77   : > { %v1130_v32 = vunpack.c.l.bf16 %v1882_v20  ;;  %v1131_v33 = vunpack.c.h.bf16 %v1882_v20  ;;  %v1175_v34 = vld [vmem:[%s1848_s26 + $0x60] sm:$0xff]   ;;  %v1176_v35 = vld [vmem:[%s1848_s26 + $0x68] sm:$0xff]   ;;  %v1177_v36 = vld [vmem:[%s1848_s26 + $0x70] sm:$0xff]   ;;  %v1134_v37 = vunpack.c.l.bf16 %v1171_v21  ;;  %v1135_v38 = vunpack.c.h.bf16 %v1171_v21  ;;  %s1949_s22 = scalar_lea.hbm %s2065_s7, %s1943_s13  ;;  %s1601_s19 = smov [#allocation10]  }
  0x78   : > { %1200 = vmatpush3.bf16.msra.mxu0 %v1338_v2  ;;  %v1138_v39 = vunpack.c.l.bf16 %v1889_v26  ;;  %v1139_v40 = vunpack.c.h.bf16 %v1889_v26  ;;  %v1178_v41 = vld [vmem:[%s1848_s26 + $0x78] sm:$0xff]   ;;  %v1142_v42 = vunpack.c.l.bf16 %v1173_v27  ;;  %v1143_v43 = vunpack.c.h.bf16 %v1173_v27  ;;  %v1345_v46 = vld [vmem:[#allocation8] sm:$0xff]   ;;  %v1346_v55 = vld [vmem:[#allocation8 + $0x8] sm:$0xff]   ;;  %s1071_s24 = sshll.u32 %s404_s17, 3  ;;  %s836_s26 = sand.u32 1, %s1680_s11  }
  0x79   : > { %1201 = vmatprep.subr.bf16.mxu0 %v1598_v0  ;;  %v1146_v44 = vunpack.c.l.bf16 %v1174_v28  ;;  %v1147_v45 = vunpack.c.h.bf16 %v1174_v28  ;;  %v1150_v47 = vunpack.c.l.bf16 %v1175_v34  ;;  %v1151_v48 = vunpack.c.h.bf16 %v1175_v34  ;;  %1218 = vmatpush3.bf16.msra.mxu1 %v1345_v46  ;;  %v1342_v56 = vld [vmem:[#allocation6 + $0x28] sm:$0xff]   ;;  %v1347_v14 = vld [vmem:[#allocation8 + $0x10] sm:$0xff]   ;;  %s406_s20 = scalar_lea.vmem %s2063_s5, %s1071_s24  ;;  %s868_s17 = sshll.u32 %s393_s18, 4  ;;  %s1953_s17 = int_to_ptr.vmem [resolvable:$true] %s868_s17 }
  0x7a   : > { %v1154_v49 = vunpack.c.l.bf16 %v1176_v35  ;;  %v1155_v50 = vunpack.c.h.bf16 %v1176_v35  ;;  %v1158_v51 = vunpack.c.l.bf16 %v1177_v36  ;;  %v1159_v52 = vunpack.c.h.bf16 %v1177_v36  ;;  %1219 = vmatprep.subr.bf16.mxu1 %v1598_v0  ;;  %s386_s24 = scalar_lea.vmem [#allocation9], %s1931_s27  ;;  %s1959_s11 = scalar_lea.sflag [#allocation11], %s836_s26 }
  0x7b   : > { %v1162_v53 = vunpack.c.l.bf16 %v1178_v41  ;;  %v1163_v54 = vunpack.c.h.bf16 %v1178_v41  ;;  %v478_v57 = vadd.f32 %v1103_v9, %v1102_v8  ;;  %v487_v58 = vadd.f32 %v1111_v16, %v1110_v15  ;;  %s1445_s30 = scalar_lea.vmem %s1953_s17, 128  ;;  %s1449_s25 = sshll.u32 %s1601_s19, 4  ;;  %s1450_s25 = int_to_ptr.vmem [resolvable:$false] %s1449_s25 }
  0x7c   : > { %1202 = vmatpush3.bf16.msra.mxu0 %v1339_v3  ;;  %v496_v59 = vadd.f32 %v1119_v23, %v1118_v22  ;;  %v505_v60 = vadd.f32 %v1127_v31, %v1126_v30  ;;  %v514_v61 = vadd.f32 %v1135_v38, %v1134_v37  ;;  %v523_v62 = vadd.f32 %v1143_v43, %v1142_v42  ;;  %p1446_p1 = scmp.ne.s32.totalorder %s1953_s17, %s1445_s30  ;;  %p1452_p12 = scmp.lt.s32.totalorder %s1953_s17, %s1450_s25 }
  0x7d   : > { %1203 = vmatprep.subr.bf16.mxu0 %v1598_v0  ;;  %v532_v63 = vadd.f32 %v1151_v48, %v1150_v47  ;;  %v541_v1 = vadd.f32 %v1159_v52, %v1158_v51  ;;  %v479_v2 = vadd.f32 %v1106_v10, %v478_v57  ;;  %v488_v3 = vadd.f32 %v1114_v17, %v487_v58  ;;  %v1343_v10 = vld [vmem:[#allocation6 + $0x30] sm:$0xff]  }
  0x7e   : > { %v506_v5 = vadd.f32 %v1130_v32, %v505_v60  ;;  %v515_v7 = vadd.f32 %v1138_v39, %v514_v61  ;;  %v524_v8 = vadd.f32 %v1146_v44, %v523_v62  ;;  %1220 = vmatpush3.bf16.msra.mxu1 %v1346_v55  ;;  %vm568_vm6 = vcmask 1046534   ;;  %p1447_p5 = pnand %p1446_p1, %p2091_p13 }
  0x7f   : > { %v533_v9 = vadd.f32 %v1154_v49, %v532_v63  ;;  %v542_v13 = vadd.f32 %v1162_v53, %v541_v1  ;;  %v480_v15 = vadd.f32 %v1107_v11, %v479_v2  ;;  %v489_v16 = vadd.f32 %v1115_v18, %v488_v3  ;;  %1221 = vmatprep.subr.bf16.mxu1 %v1598_v0 }
  0x80   : > { %1204 = vmatpush3.bf16.msra.mxu0 %v1340_v4  ;;  %v497_v4 = vadd.f32 %v1122_v24, %v496_v59  ;;  %v507_v20 = vadd.f32 %v1131_v33, %v506_v5  ;;  %v516_v17 = vadd.f32 %v1139_v40, %v515_v7  ;;  %v525_v21 = vadd.f32 %v1147_v45, %v524_v8  ;;  %v1344_v33 = vld [vmem:[#allocation6 + $0x38] sm:$0xff]   ;;  %p1448_p7 = pneg %p1447_p5 }
  0x81   : > { %1205 = vmatprep.subr.bf16.mxu0 %v1598_v0  ;;  %v534_v22 = vadd.f32 %v1155_v50, %v533_v9  ;;  %v543_v23 = vadd.f32 %v1163_v54, %v542_v13  ;;  %v481_v24 = vrot.slane %v480_v15, 4  ;;  %v490_v26 = vrot.slane %v489_v16, 4 }
  0x82   : > { %v498_v19 = vadd.f32 %v1123_v25, %v497_v4  ;;  %v508_v6 = vrot.slane %v507_v20, 4  ;;  %v517_v11 = vrot.slane %v516_v17, 4  ;;  %v526_v28 = vrot.slane %v525_v21, 4  ;;  %1222 = vmatpush3.bf16.msra.mxu1 %v1347_v14  ;;  %v1348_v25 = vld [vmem:[#allocation8 + $0x18] sm:$0xff]  }
  0x83   : > { %v535_v12 = vrot.slane %v534_v22, 4  ;;  %v544_v18 = vrot.slane %v543_v23, 4  ;;  %v491_v30 = vadd.f32 %v490_v26, %v489_v16  ;;  %1223 = vmatprep.subr.bf16.mxu1 %v1598_v0  ;;  %vm570_vm7 = vcmask 1047559  }
  0x84   : > { %1206 = vmatpush3.bf16.msra.mxu0 %v1341_v29  ;;  %v499_v27 = vrot.slane %v498_v19, 4  ;;  %v482_v29 = vadd.f32 %v481_v24, %v480_v15  ;;  %v509_v32 = vadd.f32 %v508_v6, %v507_v20  ;;  %v518_v34 = vadd.f32 %v517_v11, %v516_v17  ;;  %v1349_v17 = vld [vmem:[#allocation8 + $0x20] sm:$0xff]  }
  0x85   : > { %1207 = vmatprep.subr.bf16.mxu0 %v1598_v0  ;;  %v527_v35 = vadd.f32 %v526_v28, %v525_v21  ;;  %v536_v36 = vadd.f32 %v535_v12, %v534_v22  ;;  %v545_v37 = vadd.f32 %v544_v18, %v543_v23  ;;  %v492_v39 = vrot.slane %v491_v30, 2  ;;  %v1350_v21 = vld [vmem:[#allocation8 + $0x28] sm:$0xff]   ;;  %v1351_v22 = vld [vmem:[#allocation8 + $0x30] sm:$0xff]   ;;  %v1352_v23 = vld [vmem:[#allocation8 + $0x38] sm:$0xff]  }
  0x86   : > { %v500_v31 = vadd.f32 %v499_v27, %v498_v19  ;;  %v483_v38 = vrot.slane %v482_v29, 2  ;;  %v510_v41 = vrot.slane %v509_v32, 2  ;;  %v519_v42 = vrot.slane %v518_v34, 2  ;;  %1224 = vmatpush3.bf16.msra.mxu1 %v1348_v25  ;;  %v1072_v24 = vld [vmem:[%s2060_s2] ss:$0 sm:$0xff] }
  0x87   : > { %v528_v43 = vrot.slane %v527_v35, 2  ;;  %v537_v44 = vrot.slane %v536_v36, 2  ;;  %v546_v45 = vrot.slane %v545_v37, 2  ;;  %v493_v47 = vadd.f32 %v492_v39, %v491_v30  ;;  %1225 = vmatprep.subr.bf16.mxu1 %v1598_v0 }
  0x88   : > { %1208 = vmatpush3.bf16.msra.mxu0 %v1342_v56  ;;  %v501_v40 = vrot.slane %v500_v31, 2  ;;  %v484_v46 = vadd.f32 %v483_v38, %v482_v29  ;;  %v511_v49 = vadd.f32 %v510_v41, %v509_v32  ;;  %v520_v50 = vadd.f32 %v519_v42, %v518_v34 }
  0x89   : > { %1209 = vmatprep.subr.bf16.mxu0 %v1598_v0  ;;  %v529_v51 = vadd.f32 %v528_v43, %v527_v35  ;;  %v538_v52 = vadd.f32 %v537_v44, %v536_v36  ;;  %v547_v53 = vadd.f32 %v546_v45, %v545_v37  ;;  %v494_v55 = vrot.slane %v493_v47, 1  ;;  %v821_v37 = vld [vmem:[%s406_s20] sm:$0xff] }
  0x8a   : > { %v502_v48 = vadd.f32 %v501_v40, %v500_v31  ;;  %v485_v54 = vrot.slane %v484_v46, 1  ;;  %v512_v57 = vrot.slane %v511_v49, 1  ;;  %v521_v58 = vrot.slane %v520_v50, 1  ;;  %1226 = vmatpush3.bf16.msra.mxu1 %v1349_v17 }
  0x8b   : > { %v530_v59 = vrot.slane %v529_v51, 1  ;;  %v539_v60 = vrot.slane %v538_v52, 1  ;;  %v548_v61 = vrot.slane %v547_v53, 1  ;;  %v495_v63 = vadd.f32 %v494_v55, %v493_v47  ;;  %1227 = vmatprep.subr.bf16.mxu1 %v1598_v0 }
  0x8c   : > { %1210 = vmatpush3.bf16.msra.mxu0 %v1343_v10  ;;  %v503_v56 = vrot.slane %v502_v48, 1  ;;  %v486_v62 = vadd.f32 %v485_v54, %v484_v46  ;;  %v513_v2 = vadd.f32 %v512_v57, %v511_v49  ;;  %v522_v3 = vadd.f32 %v521_v58, %v520_v50 }
  0x8d   : > { %1211 = vmatprep.subr.bf16.mxu0 %v1598_v0  ;;  %v531_v4 = vadd.f32 %v530_v59, %v529_v51  ;;  %v540_v7 = vadd.f32 %v539_v60, %v538_v52  ;;  %v549_v9 = vadd.f32 %v548_v61, %v547_v53  ;;  %v806_v25 = vlaneseq }
  0x8e   : > { %v504_v1 = vadd.f32 %v503_v56, %v502_v48  ;;  %v559_v5 = vsel %vm558_vm1, %v495_v63, %v486_v62  ;;  %1228 = vmatpush3.bf16.msra.mxu1 %v1350_v21  ;;  %v1600_v36 = vmov 0  }
  0x8f   : > { %1229 = vmatprep.subr.bf16.mxu1 %v1598_v0  ;;  %v807_v29 = vand.u32 127, %v806_v25  ;;  %1335 = vset.pattern.permute.xlu1 %v1600_v36 }
  0x90   : > { %1212 = vmatpush3.bf16.msra.mxu0 %v1344_v33  ;;  %v561_v8 = vsel %vm560_vm2, %v504_v1, %v559_v5  ;;  %1336 = vset.pattern.permute.xlu0 %v1600_v36 }
  0x91   : > { %v563_v13 = vsel %vm562_vm3, %v513_v2, %v561_v8  ;;  %vm808_vm8 = vcmp.lt.s32.totalorder %v807_v29, 5  ;;  %823 = vperm.xlu1 %1335, %v821_v37  }
  0x92   : > { %v565_v14 = vsel %vm564_vm4, %v522_v3, %v563_v13  ;;  %1230 = vmatpush3.bf16.msra.mxu1 %v1351_v22 }
  0x93   : > { %v567_v15 = vsel %vm566_vm5, %v531_v4, %v565_v14  ;;  %1231 = vmatprep.subr.bf16.mxu1 %v1598_v0  ;;  %v1081_v0 = vld [vmem:[%s2062_s4] ss:$0 sm:$0xff] }
  0x94   : > { %v569_v16 = vsel %vm568_vm6, %v540_v7, %v567_v15 }
  0x95   : > { %v571_v19 = vsel %vm570_vm7, %v549_v9, %v569_v16 }
  0x96   : > { %v1917_v20 = vmul.f32 0.03125, %v571_v19  ;;  %1232 = vmatpush3.bf16.msra.mxu1 %v1352_v23 }
  0x98   : > { %v581_v10 = vpack.c.bf16 %v1917_v20, %v1917_v20  ;;  %580 = vst [vmem:[%s386_s24] sm:$0xff] %v1917_v20 }
  0x9a   : > { %1214 = vmatmul.mubr.bf16.vlgmr.msra.gmra.mrb[0].mxu0 %v581_v10 }
 0x110   : > { %v824_v43 = vpop.permute.xlu1 %823 }
 0x111   : > { %vm825_vm9 = vcmp.eq.s32.totalorder %v807_v29, %v824_v43 }
 0x16d   : > { %v687_v26 = vpop.f32.mrb[0].mxu0 }
 0x16e   : > { %v688_v27 = vadd.f32 %v1072_v24, %v687_v26  ;;  %v1215_v6 = vpop.f32.mrb[1].mxu0 }
 0x16f   : > { %v690_v11 = vpop.f32.mrb[2].mxu0 }
 0x170   : > { %1353 = vtanh.f32 %v688_v27  ;;  %v1216_v28 = vpop.f32.mrb[3].mxu0 }
 0x17a   : > { %v1354_v12 = vpop.eup %1353 }
 0x17b   : > { %v694_v18 = vpack.c.bf16 %v1354_v12, %v1354_v12 }
 0x17d   : > { %1234 = vmatmul.mubr.bf16.vlgmr.msra.gmra.mrb[0].mxu1 %v694_v18 }
 0x250   : > { %v800_v30 = vpop.f32.mrb[0].mxu1 }
 0x251   : > { %v801_v31 = vadd.f32 %v1081_v0, %v800_v30  ;;  %v1235_v32 = vpop.f32.mrb[1].mxu1 }
 0x252   : > { %v803_v33 = vpop.f32.mrb[2].mxu1 }
 0x253   : > { %v1236_v34 = vpop.f32.mrb[3].mxu1  ;;  %v809_v35 = vsel %vm808_vm8, %v801_v31, -1e+30 }
 0x254   : > { %811 = vmax.xlane.f32.xlu0 %v809_v35  ;;  %810 = vst [vmem:[%s393_s18] sm:$0xff] %v809_v35  ;;  %s1451_s18 = scalar_lea.vmem %s1450_s25, 256 }
 0x255   : > { %p1453_p0 = scmp.lt.s32.totalorder %s1451_s18, %s1445_s30 }
 0x257   : > { %p1454_p2 = por %p1453_p0, %p1452_p12 }
 0x259   : > { %p1455_p6 = pnand %p1454_p2, %p1448_p7 }
 0x2e1   : > { %v812_v38 = vpop.xlane.xlu0 %811 }
 0x2e2   : > { %v813_v39 = vsub.f32 %v809_v35, %v812_v38 }
 0x2e4   : > { %v814_v40 = vmul.f32 1.442695, %v813_v39 }
 0x2e6   : > { %1355 = vpow2.f32 %v814_v40 }
 0x2f0   : > { %v1356_v41 = vpop.eup %1355 }
 0x2f1   : > { %816 = vadd.xlane.f32.xlu0 %v1356_v41 }
 0x37e   : > { %v817_v42 = vpop.xlane.xlu0 %816 }
 0x37f   : > { %1357 = vlog2.f32 %v817_v42 }
 0x389   : > { %v1358_v44 = vpop.eup %1357 }
 0x38a   : > { %v819_v45 = vmul.f32 0.6931472, %v1358_v44 }
 0x38c   : > { %v820_v46 = vsub.f32 %v813_v39, %v819_v45 }
 0x38e   : > { %v826_v47 = vsel %vm825_vm9, %v820_v46, 0.0 }
 0x38f   : > { %827 = vadd.xlane.f32.xlu1 %v826_v47 }
 0x390   : > { %1458 = shalt.err (!%p1455_p6)
}
 0x391   : > { %s1459_s20 = scalar_lea.hbm %s1949_s22, 128  ;;  %s1463_s21 = scalar_lea.hbm %s2065_s7, 256 }
 0x392   : > { %p1460_p10 = scmp.ne.s32.totalorder %s1949_s22, %s1459_s20  ;;  %p1464_p9 = scmp.lt.u32.totalorder %s1949_s22, %s2065_s7 }
 0x393   : > { %p1465_p8 = scmp.lt.u32.totalorder %s1463_s21, %s1459_s20  ;;  %p1467_p1 = scmp.lt.u32.totalorder %s1459_s20, %s1949_s22 }
 0x394   : > { %p1461_p3 = pnand %p1460_p10, %p2091_p13 }
 0x395   : > { %p1466_p11 = por %p1465_p8, %p1464_p9 }
 0x396   : > { %p1462_p4 = pneg %p1461_p3 }
 0x397   : > { %p1468_p5 = por %p1467_p1, %p1466_p11 }
 0x399   : > { %p1469_p7 = pnand %p1468_p5, %p1462_p4 }
 0x39b   : > { %1472 = shalt.err (!%p1469_p7)
}
 0x39c   : > { %1248 = dma.vmem_to_hbm [thread:$0]  (%p2091_p13), %s1953_s17, 128, %s1949_s22, %s1959_s11  }
 0x39d   : > { %s1987_s26 = scalar_lea.hbm %s2064_s6, %s1943_s13  ;;  %s855_s20 = sshll.u32 %s386_s24, 4  ;;  %s856_s20 = int_to_ptr.vmem [resolvable:$true] %s855_s20 }
 0x39e   : > { %s832_s15 = scalar_lea.sflag [#allocation5], %s1844_s12  ;;  %s1473_s21 = scalar_lea.vmem %s856_s20, 128 }
 0x39f   : > { %p1474_p12 = scmp.ne.s32.totalorder %s856_s20, %s1473_s21  ;;  %s1602_s19 = smov [#allocation9]  }
 0x3a0   : > { %s1477_s25 = sshll.u32 %s1602_s19, 4  ;;  %s1478_s25 = int_to_ptr.vmem [resolvable:$false] %s1477_s25 }
 0x3a1   : > { %p1475_p0 = pnand %p1474_p12, %p2091_p13  ;;  %s1479_s0 = scalar_lea.vmem %s1478_s25, 256 }
 0x3a2   : > { %p1480_p6 = scmp.lt.s32.totalorder %s856_s20, %s1478_s25  ;;  %p1481_p10 = scmp.lt.s32.totalorder %s1479_s0, %s1473_s21 }
 0x3a3   : > { %p1476_p2 = pneg %p1475_p0 }
 0x3a4   : > { %p1482_p3 = por %p1481_p10, %p1480_p6 }
 0x3a6   : > { %p1483_p4 = pnand %p1482_p3, %p1476_p2 }
 0x3a8   : > { %1486 = shalt.err (!%p1483_p4)
}
 0x3a9   : > { %s1487_s12 = scalar_lea.hbm %s1987_s26, 128  ;;  %s1491_s24 = scalar_lea.hbm %s2064_s6, 256 }
 0x3aa   : > { %p1488_p9 = scmp.ne.s32.totalorder %s1987_s26, %s1487_s12  ;;  %p1492_p1 = scmp.lt.u32.totalorder %s1987_s26, %s2064_s6 }
 0x3ab   : > { %p1493_p5 = scmp.lt.u32.totalorder %s1491_s24, %s1487_s12  ;;  %p1495_p12 = scmp.lt.u32.totalorder %s1487_s12, %s1987_s26 }
 0x3ac   : > { %p1489_p8 = pnand %p1488_p9, %p2091_p13 }
 0x3ad   : > { %p1494_p7 = por %p1493_p5, %p1492_p1 }
 0x3ae   : > { %p1490_p11 = pneg %p1489_p8 }
 0x3af   : > { %p1496_p0 = por %p1495_p12, %p1494_p7 }
 0x3b1   : > { %p1497_p2 = pnand %p1496_p0, %p1490_p11 }
 0x3b3   : > { %1500 = shalt.err (!%p1497_p2)
}
 0x3b4   : > { %1247 = dma.vmem_to_hbm [thread:$0]  (%p2091_p13), %s856_s20, 128, %s1987_s26, %s832_s15  }
 0x3b5   : > { %s400_s0 = scalar_lea.vmem [#allocation12], %s1931_s27  ;;  %s879_s12 = scalar_lea.hbm %s2066_s8, %s1943_s13 }
 0x3b6   : > { %s881_s21 = sshll.u32 %s400_s0, 4  ;;  %s1603_s26 = smov [#allocation12]   ;;  %s2010_s21 = int_to_ptr.vmem [resolvable:$true] %s881_s21 }
 0x3b7   : > { %s1501_s22 = scalar_lea.vmem %s2010_s21, 128  ;;  %s1505_s27 = sshll.u32 %s1603_s26, 4  ;;  %s1506_s27 = int_to_ptr.vmem [resolvable:$false] %s1505_s27 }
 0x3b8   : > { %p1502_p6 = scmp.ne.s32.totalorder %s2010_s21, %s1501_s22  ;;  %s1507_s20 = scalar_lea.vmem %s1506_s27, 256 }
 0x3b9   : > { %p1508_p4 = scmp.lt.s32.totalorder %s2010_s21, %s1506_s27  ;;  %p1509_p9 = scmp.lt.s32.totalorder %s1507_s20, %s1501_s22 }
 0x3ba   : > { %p1503_p10 = pnand %p1502_p6, %p2091_p13 }
 0x3bb   : > { %p1510_p8 = por %p1509_p9, %p1508_p4 }
 0x3bc   : > { %p1504_p3 = pneg %p1503_p10 }
 0x3be   : > { %p1511_p11 = pnand %p1510_p8, %p1504_p3 }
 0x41c   : > { %v828_v48 = vpop.xlane.xlu1 %827 }
 0x41d   : > { %v829_v49 = vsub.f32 0.0, %v828_v48 }
 0x41f   : > { %830 = vst [vmem:[%s400_s0] sm:$0xff] %v829_v49 }
 0x420   : > { %1514 = shalt.err (!%p1511_p11)
}
 0x421   : > { %s1515_s15 = scalar_lea.hbm %s879_s12, 128  ;;  %s1519_s24 = scalar_lea.hbm %s2066_s8, 256 }
 0x422   : > { %p1516_p1 = scmp.ne.s32.totalorder %s879_s12, %s1515_s15  ;;  %p1520_p12 = scmp.lt.u32.totalorder %s879_s12, %s2066_s8 }
 0x423   : > { %p1521_p0 = scmp.lt.u32.totalorder %s1519_s24, %s1515_s15  ;;  %p1523_p6 = scmp.lt.u32.totalorder %s1515_s15, %s879_s12 }
 0x424   : > { %p1517_p5 = pnand %p1516_p1, %p2091_p13 }
 0x425   : > { %p1522_p2 = por %p1521_p0, %p1520_p12 }
 0x426   : > { %p1518_p7 = pneg %p1517_p5 }
 0x427   : > { %p1524_p10 = por %p1523_p6, %p1522_p2 }
 0x429   : > { %p1525_p3 = pnand %p1524_p10, %p1518_p7 }
 0x42b   : > { %1528 = shalt.err (!%p1525_p3)
}
 0x42c   : > { %1249 = dma.vmem_to_hbm [thread:$0]  (%p2091_p13), %s2010_s21, 128, %s879_s12, %s1959_s11  }
 0x42d PF: > { %s2092_s0 = sld [smem:[#allocation17_spill]]  ;;  %s2093_s19 = sld [smem:[#allocation18_spill]] }
 0x42e   : > { %p2095_p9 = scmp.ge.s32.totalorder %s1591_s10, 2 }
 0x433   : > { %s893_s25 = sand.u32 1, %s2092_s0   ;;  %p2094_p4 = scmp.ne.s32.totalorder %s2093_s19, 0 }
 0x434   : > { %s894_s22 = scalar_lea.sflag [#allocation5], %s893_s25 }
 0x435   : > { %p1265_p8 = pnand %p2095_p9, %p2094_p4 }
 0x437   : > { %1562 = dma.done.wait (!%p1265_p8), %s894_s22, 128  }
 0x438   : > { %1564 = vsyncadd (!%p1265_p8), %s894_s22, 4294967168  ;;  %s2096_s26 = sadd.s32 4294967294, %s1591_s10  }
 0x439   : > { %s902_s27 = sand.u32 1, %s2096_s26  }
 0x43a   : > { %s903_s20 = scalar_lea.sflag [#allocation11], %s902_s27 }
 0x43b   : > { %1566 = dma.done.wait (!%p1265_p8), %s903_s20, 256  }
 0x43c   : > { %1568 = vsyncadd (!%p1265_p8), %s903_s20, 4294967040  ;;  %s29_s10 = sadd.s32 1, %s1591_s10   ;;  %s2097_s27 = smov %s1575_s28 }
 0x43d   : > { %p26_p13 = scmp.ge.s32.totalorder %s29_s10, 4   ;;  %s2098_s28 = smov %s1579_s29 }
 0x43e   : > { %s2099_s29 = smov %s1795_s16  ;;  %s2100_s30 = smov %s1587_s9 }
 0x43f   : > { %s2101_s9 = smov %s2103_s14  ;;  %28 = sbr.rel (!%p26_p13) target bundleno = 11 (0xb), region = 140 }
 0x446   :  { %917 = vsyncpa [#allocation4], 1 }
 0x447   :  { %919 = vsyncpa [#allocation4 + $0x1], 1 }
 0x448   :  { %920 = vsyncpa [#allocation7], 1 }
 0x449   :  { %921 = vsyncpa [#allocation5], 1 }
 0x44a   :  { %923 = vsyncpa [#allocation5 + $0x1], 1 }
 0x44b   :  { %924 = vsyncpa [#allocation11], 1 }
 0x44c   :  { %926 = vsyncpa [#allocation11 + $0x1], 1 }

</bundles_post_ra>
